<compile_context>
chip_gen: v5e
topology: v5e:2x2
jax: 0.10.0
libtpu: 0.0.40
codegen_flags: <defaults>
</compile_context>

<pallas_src>
from functools import partial

import jax
import jax.numpy as jnp
from jax.experimental import pallas as pl
from jax.experimental.pallas import tpu as pltpu

# ---- model hyper-parameters (small, consistent with the module) ----
IMG_H = 8                    # img_height  -> seq_len
IMG_W = 8                    # img_width
IN_CH = 3
INPUT_DIM = IMG_W * 3        # 24
HIDDEN_DIM = 64
OUTPUT_DIM = 10
BATCH = 2


# ------------------------- Pallas kernel -------------------------
def liquid_kernel(x_ref, win_ref, whh_ref, inv_tau_ref, wfc_ref, bfc_ref,
                  out_ref, *, batch, seq):
    """x: (B*S, F) row-major (row = b*S + t)   win: (F, H)   whh: (H, H)
       inv_tau: (1, H)   wfc: (H, O)   bfc: (1, O)   out: (B, O)"""
    H = whh_ref.shape[0]

    whh = whh_ref[...]
    inv_tau = inv_tau_ref[...]                       # (1, H) broadcasts over batch

    # Hoisted input projection: a single (B*S, F) x (F, H) matmul outside the
    # recurrence instead of S dependent (B, F) x (F, H) matmuls inside it.
    u_all = jnp.dot(x_ref[...], win_ref[...],
                    preferred_element_type=jnp.float32)   # (B*S, H)

    h = jnp.zeros((batch, H), jnp.float32)

    # seq is tiny and static: fully unroll so the scheduler can overlap the
    # EUP tanh / VPU state update of step t with the MXU work of step t+1.
    for t in range(seq):
        # Gather timestep t's rows (row b*seq + t for each batch element) into
        # a (B, H) tile using static 2-D slices + a sublane concat (cheap, and
        # off the MXU-bound critical path).
        u_t = jnp.concatenate(
            [u_all[b * seq + t: b * seq + t + 1, :] for b in range(batch)],
            axis=0)                                        # (B, H)
        pre = jnp.tanh(u_t + jnp.dot(h, whh,
                                     preferred_element_type=jnp.float32))
        # h = h + (tanh(u + h@Whh) - h) / tau   (tau passed as reciprocal)
        h = h + (pre - h) * inv_tau

    # fc head: h @ Wfc + b
    out_ref[...] = (jnp.dot(h, wfc_ref[...],
                            preferred_element_type=jnp.float32)
                    + bfc_ref[...])


def liquid_nn_forward(x_img, params):
    """x_img: (B, 3, IMG_H, IMG_W) float32 (NCHW, like the PyTorch input)."""
    win, whh, tau, wfc, bfc = params
    B = x_img.shape[0]

    # torch: x.view(B, img_height, img_width*3) is a row-major reshape; flatten
    # the (B, S) leading dims too so the kernel sees one 2-D matmul operand.
    # Both reshapes are free row-major views -- no transpose HLO is emitted.
    x_flat = x_img.reshape(B * IMG_H, IMG_W * 3)            # (B*S, F)

    inv_tau = (1.0 / tau).reshape(1, HIDDEN_DIM)            # loop-invariant
    bfc2d = bfc.reshape(1, OUTPUT_DIM)

    vmem = pl.BlockSpec(memory_space=pltpu.MemorySpace.VMEM)
    out = pl.pallas_call(
        partial(liquid_kernel, batch=B, seq=IMG_H),
        out_shape=jax.ShapeDtypeStruct((B, OUTPUT_DIM), jnp.float32),
        in_specs=[vmem] * 6,
        out_specs=vmem,
    )(x_flat, win, whh, inv_tau, wfc, bfc2d)
    return out


# ------------------------- parameter init -------------------------
def init_params(key):
    k1, k2, k3, k4 = jax.random.split(key, 4)

    # input_weight: xavier_uniform_ on (INPUT_DIM, HIDDEN_DIM)
    bound = (6.0 / (INPUT_DIM + HIDDEN_DIM)) ** 0.5
    win = jax.random.uniform(k1, (INPUT_DIM, HIDDEN_DIM),
                             minval=-bound, maxval=bound, dtype=jnp.float32)

    # hidden_weight: orthogonal_ on (HIDDEN_DIM, HIDDEN_DIM)
    a = jax.random.normal(k2, (HIDDEN_DIM, HIDDEN_DIM), dtype=jnp.float32)
    q, r = jnp.linalg.qr(a)
    d = jnp.sign(jnp.diag(r))
    d = jnp.where(d == 0, 1.0, d)                 # guard the zero-sign edge case
    whh = (q * d[None, :]).astype(jnp.float32)

    # time_constant: filled with 1.0
    tau = jnp.ones((HIDDEN_DIM,), jnp.float32)

    # fc = nn.Linear(HIDDEN_DIM, OUTPUT_DIM): uniform(-1/sqrt(H), 1/sqrt(H))
    lb = 1.0 / (HIDDEN_DIM ** 0.5)
    wfc = jax.random.uniform(k3, (HIDDEN_DIM, OUTPUT_DIM),
                             minval=-lb, maxval=lb, dtype=jnp.float32)
    bfc = jax.random.uniform(k4, (OUTPUT_DIM,),
                             minval=-lb, maxval=lb, dtype=jnp.float32)
    return win, whh, tau, wfc, bfc


# ------------------------- pure-JAX reference -------------------------
def reference_forward(x_img, params):
    win, whh, tau, wfc, bfc = params
    B = x_img.shape[0]
    x = x_img.reshape(B, IMG_H, IMG_W * 3)
    h = jnp.zeros((B, HIDDEN_DIM), jnp.float32)
    for t in range(IMG_H):
        u = x[:, t, :] @ win
        h = h + (jnp.tanh(u + h @ whh) - h) / tau
    return h @ wfc + bfc


if __name__ == "__main__":
    key = jax.random.PRNGKey(0)
    kx, kp = jax.random.split(key)

    x = jax.random.normal(kx, (BATCH, IN_CH, IMG_H, IMG_W), dtype=jnp.float32)
    params = init_params(kp)

    out = liquid_nn_forward(x, params)
    out = jax.block_until_ready(out)

    ref = reference_forward(x, params)
    assert out.shape == (BATCH, OUTPUT_DIM)
    assert jnp.allclose(out, ref, atol=1e-5, rtol=1e-5), "mismatch vs reference"

    print("KERNEL_OK")
</pallas_src>

<mosaic_0001>
module attributes {stable_mosaic.version = 11 : i64} {
  func.func @liquid_kernel(%arg0: memref<16x24xf32, #tpu.memory_space<vmem>>, %arg1: memref<24x64xf32, #tpu.memory_space<vmem>>, %arg2: memref<64x64xf32, #tpu.memory_space<vmem>>, %arg3: memref<1x64xf32, #tpu.memory_space<vmem>>, %arg4: memref<64x10xf32, #tpu.memory_space<vmem>>, %arg5: memref<1x10xf32, #tpu.memory_space<vmem>>, %arg6: memref<2x10xf32, #tpu.memory_space<vmem>>) attributes {dimension_semantics = [], scalar_prefetch = 0 : i64, scratch_operands = 0 : i64, tpu.core_type = #tpu.core_type<tc>} {
    %c0 = arith.constant 0 : index
    %c0_0 = arith.constant 0 : index
    %0 = vector.load %arg2[%c0, %c0_0] : memref<64x64xf32, #tpu.memory_space<vmem>>, vector<64x64xf32>
    %c0_1 = arith.constant 0 : index
    %c0_2 = arith.constant 0 : index
    %1 = vector.load %arg3[%c0_1, %c0_2] : memref<1x64xf32, #tpu.memory_space<vmem>>, vector<1x64xf32>
    %c0_3 = arith.constant 0 : index
    %c0_4 = arith.constant 0 : index
    %2 = vector.load %arg0[%c0_3, %c0_4] : memref<16x24xf32, #tpu.memory_space<vmem>>, vector<16x24xf32>
    %c0_5 = arith.constant 0 : index
    %c0_6 = arith.constant 0 : index
    %3 = vector.load %arg1[%c0_5, %c0_6] : memref<24x64xf32, #tpu.memory_space<vmem>>, vector<24x64xf32>
    %cst = arith.constant dense<0.000000e+00> : vector<16x64xf32>
    %4 = tpu.matmul %2, %3, %cst {dimension_numbers = #tpu.dot_dimension_numbers<[1], [0], [0], [1], [0, 0, 1, 1], [], []>} : vector<16x24xf32>, vector<24x64xf32>, vector<16x64xf32> -> vector<16x64xf32>
    %cst_7 = arith.constant 0.000000e+00 : f32
    %5 = vector.broadcast %cst_7 : f32 to vector<2x64xf32>
    %6 = vector.extract_strided_slice %4 {offsets = [0, 0], sizes = [1, 64], strides = [1, 1]} : vector<16x64xf32> to vector<1x64xf32>
    %7 = vector.extract_strided_slice %4 {offsets = [8, 0], sizes = [1, 64], strides = [1, 1]} : vector<16x64xf32> to vector<1x64xf32>
    %8 = tpu.concatenate %6, %7 in 0 : vector<1x64xf32>, vector<1x64xf32> -> vector<2x64xf32>
    %cst_8 = arith.constant dense<0.000000e+00> : vector<2x64xf32>
    %9 = tpu.matmul %5, %0, %cst_8 {dimension_numbers = #tpu.dot_dimension_numbers<[1], [0], [0], [1], [0, 0, 1, 1], [], []>} : vector<2x64xf32>, vector<64x64xf32>, vector<2x64xf32> -> vector<2x64xf32>
    %10 = arith.addf %8, %9 : vector<2x64xf32>
    %11 = math.tanh %10 : vector<2x64xf32>
    %12 = arith.subf %11, %5 : vector<2x64xf32>
    %13 = vector.broadcast %1 : vector<1x64xf32> to vector<2x64xf32>
    %14 = arith.mulf %12, %13 : vector<2x64xf32>
    %15 = arith.addf %5, %14 : vector<2x64xf32>
    %16 = vector.extract_strided_slice %4 {offsets = [1, 0], sizes = [1, 64], strides = [1, 1]} : vector<16x64xf32> to vector<1x64xf32>
    %17 = vector.extract_strided_slice %4 {offsets = [9, 0], sizes = [1, 64], strides = [1, 1]} : vector<16x64xf32> to vector<1x64xf32>
    %18 = tpu.concatenate %16, %17 in 0 : vector<1x64xf32>, vector<1x64xf32> -> vector<2x64xf32>
    %cst_9 = arith.constant dense<0.000000e+00> : vector<2x64xf32>
    %19 = tpu.matmul %15, %0, %cst_9 {dimension_numbers = #tpu.dot_dimension_numbers<[1], [0], [0], [1], [0, 0, 1, 1], [], []>} : vector<2x64xf32>, vector<64x64xf32>, vector<2x64xf32> -> vector<2x64xf32>
    %20 = arith.addf %18, %19 : vector<2x64xf32>
    %21 = math.tanh %20 : vector<2x64xf32>
    %22 = arith.subf %21, %15 : vector<2x64xf32>
    %23 = vector.broadcast %1 : vector<1x64xf32> to vector<2x64xf32>
    %24 = arith.mulf %22, %23 : vector<2x64xf32>
    %25 = arith.addf %15, %24 : vector<2x64xf32>
    %26 = vector.extract_strided_slice %4 {offsets = [2, 0], sizes = [1, 64], strides = [1, 1]} : vector<16x64xf32> to vector<1x64xf32>
    %27 = vector.extract_strided_slice %4 {offsets = [10, 0], sizes = [1, 64], strides = [1, 1]} : vector<16x64xf32> to vector<1x64xf32>
    %28 = tpu.concatenate %26, %27 in 0 : vector<1x64xf32>, vector<1x64xf32> -> vector<2x64xf32>
    %cst_10 = arith.constant dense<0.000000e+00> : vector<2x64xf32>
    %29 = tpu.matmul %25, %0, %cst_10 {dimension_numbers = #tpu.dot_dimension_numbers<[1], [0], [0], [1], [0, 0, 1, 1], [], []>} : vector<2x64xf32>, vector<64x64xf32>, vector<2x64xf32> -> vector<2x64xf32>
    %30 = arith.addf %28, %29 : vector<2x64xf32>
    %31 = math.tanh %30 : vector<2x64xf32>
    %32 = arith.subf %31, %25 : vector<2x64xf32>
    %33 = vector.broadcast %1 : vector<1x64xf32> to vector<2x64xf32>
    %34 = arith.mulf %32, %33 : vector<2x64xf32>
    %35 = arith.addf %25, %34 : vector<2x64xf32>
    %36 = vector.extract_strided_slice %4 {offsets = [3, 0], sizes = [1, 64], strides = [1, 1]} : vector<16x64xf32> to vector<1x64xf32>
    %37 = vector.extract_strided_slice %4 {offsets = [11, 0], sizes = [1, 64], strides = [1, 1]} : vector<16x64xf32> to vector<1x64xf32>
    %38 = tpu.concatenate %36, %37 in 0 : vector<1x64xf32>, vector<1x64xf32> -> vector<2x64xf32>
    %cst_11 = arith.constant dense<0.000000e+00> : vector<2x64xf32>
    %39 = tpu.matmul %35, %0, %cst_11 {dimension_numbers = #tpu.dot_dimension_numbers<[1], [0], [0], [1], [0, 0, 1, 1], [], []>} : vector<2x64xf32>, vector<64x64xf32>, vector<2x64xf32> -> vector<2x64xf32>
    %40 = arith.addf %38, %39 : vector<2x64xf32>
    %41 = math.tanh %40 : vector<2x64xf32>
    %42 = arith.subf %41, %35 : vector<2x64xf32>
    %43 = vector.broadcast %1 : vector<1x64xf32> to vector<2x64xf32>
    %44 = arith.mulf %42, %43 : vector<2x64xf32>
    %45 = arith.addf %35, %44 : vector<2x64xf32>
    %46 = vector.extract_strided_slice %4 {offsets = [4, 0], sizes = [1, 64], strides = [1, 1]} : vector<16x64xf32> to vector<1x64xf32>
    %47 = vector.extract_strided_slice %4 {offsets = [12, 0], sizes = [1, 64], strides = [1, 1]} : vector<16x64xf32> to vector<1x64xf32>
    %48 = tpu.concatenate %46, %47 in 0 : vector<1x64xf32>, vector<1x64xf32> -> vector<2x64xf32>
    %cst_12 = arith.constant dense<0.000000e+00> : vector<2x64xf32>
    %49 = tpu.matmul %45, %0, %cst_12 {dimension_numbers = #tpu.dot_dimension_numbers<[1], [0], [0], [1], [0, 0, 1, 1], [], []>} : vector<2x64xf32>, vector<64x64xf32>, vector<2x64xf32> -> vector<2x64xf32>
    %50 = arith.addf %48, %49 : vector<2x64xf32>
    %51 = math.tanh %50 : vector<2x64xf32>
    %52 = arith.subf %51, %45 : vector<2x64xf32>
    %53 = vector.broadcast %1 : vector<1x64xf32> to vector<2x64xf32>
    %54 = arith.mulf %52, %53 : vector<2x64xf32>
    %55 = arith.addf %45, %54 : vector<2x64xf32>
    %56 = vector.extract_strided_slice %4 {offsets = [5, 0], sizes = [1, 64], strides = [1, 1]} : vector<16x64xf32> to vector<1x64xf32>
    %57 = vector.extract_strided_slice %4 {offsets = [13, 0], sizes = [1, 64], strides = [1, 1]} : vector<16x64xf32> to vector<1x64xf32>
    %58 = tpu.concatenate %56, %57 in 0 : vector<1x64xf32>, vector<1x64xf32> -> vector<2x64xf32>
    %cst_13 = arith.constant dense<0.000000e+00> : vector<2x64xf32>
    %59 = tpu.matmul %55, %0, %cst_13 {dimension_numbers = #tpu.dot_dimension_numbers<[1], [0], [0], [1], [0, 0, 1, 1], [], []>} : vector<2x64xf32>, vector<64x64xf32>, vector<2x64xf32> -> vector<2x64xf32>
    %60 = arith.addf %58, %59 : vector<2x64xf32>
    %61 = math.tanh %60 : vector<2x64xf32>
    %62 = arith.subf %61, %55 : vector<2x64xf32>
    %63 = vector.broadcast %1 : vector<1x64xf32> to vector<2x64xf32>
    %64 = arith.mulf %62, %63 : vector<2x64xf32>
    %65 = arith.addf %55, %64 : vector<2x64xf32>
    %66 = vector.extract_strided_slice %4 {offsets = [6, 0], sizes = [1, 64], strides = [1, 1]} : vector<16x64xf32> to vector<1x64xf32>
    %67 = vector.extract_strided_slice %4 {offsets = [14, 0], sizes = [1, 64], strides = [1, 1]} : vector<16x64xf32> to vector<1x64xf32>
    %68 = tpu.concatenate %66, %67 in 0 : vector<1x64xf32>, vector<1x64xf32> -> vector<2x64xf32>
    %cst_14 = arith.constant dense<0.000000e+00> : vector<2x64xf32>
    %69 = tpu.matmul %65, %0, %cst_14 {dimension_numbers = #tpu.dot_dimension_numbers<[1], [0], [0], [1], [0, 0, 1, 1], [], []>} : vector<2x64xf32>, vector<64x64xf32>, vector<2x64xf32> -> vector<2x64xf32>
    %70 = arith.addf %68, %69 : vector<2x64xf32>
    %71 = math.tanh %70 : vector<2x64xf32>
    %72 = arith.subf %71, %65 : vector<2x64xf32>
    %73 = vector.broadcast %1 : vector<1x64xf32> to vector<2x64xf32>
    %74 = arith.mulf %72, %73 : vector<2x64xf32>
    %75 = arith.addf %65, %74 : vector<2x64xf32>
    %76 = vector.extract_strided_slice %4 {offsets = [7, 0], sizes = [1, 64], strides = [1, 1]} : vector<16x64xf32> to vector<1x64xf32>
    %77 = vector.extract_strided_slice %4 {offsets = [15, 0], sizes = [1, 64], strides = [1, 1]} : vector<16x64xf32> to vector<1x64xf32>
    %78 = tpu.concatenate %76, %77 in 0 : vector<1x64xf32>, vector<1x64xf32> -> vector<2x64xf32>
    %cst_15 = arith.constant dense<0.000000e+00> : vector<2x64xf32>
    %79 = tpu.matmul %75, %0, %cst_15 {dimension_numbers = #tpu.dot_dimension_numbers<[1], [0], [0], [1], [0, 0, 1, 1], [], []>} : vector<2x64xf32>, vector<64x64xf32>, vector<2x64xf32> -> vector<2x64xf32>
    %80 = arith.addf %78, %79 : vector<2x64xf32>
    %81 = math.tanh %80 : vector<2x64xf32>
    %82 = arith.subf %81, %75 : vector<2x64xf32>
    %83 = vector.broadcast %1 : vector<1x64xf32> to vector<2x64xf32>
    %84 = arith.mulf %82, %83 : vector<2x64xf32>
    %85 = arith.addf %75, %84 : vector<2x64xf32>
    %c0_16 = arith.constant 0 : index
    %c0_17 = arith.constant 0 : index
    %86 = vector.load %arg4[%c0_16, %c0_17] : memref<64x10xf32, #tpu.memory_space<vmem>>, vector<64x10xf32>
    %cst_18 = arith.constant dense<0.000000e+00> : vector<2x10xf32>
    %87 = tpu.matmul %85, %86, %cst_18 {dimension_numbers = #tpu.dot_dimension_numbers<[1], [0], [0], [1], [0, 0, 1, 1], [], []>} : vector<2x64xf32>, vector<64x10xf32>, vector<2x10xf32> -> vector<2x10xf32>
    %c0_19 = arith.constant 0 : index
    %c0_20 = arith.constant 0 : index
    %88 = vector.load %arg5[%c0_19, %c0_20] : memref<1x10xf32, #tpu.memory_space<vmem>>, vector<1x10xf32>
    %89 = vector.broadcast %88 : vector<1x10xf32> to vector<2x10xf32>
    %90 = arith.addf %87, %89 : vector<2x10xf32>
    %c0_21 = arith.constant 0 : index
    %c0_22 = arith.constant 0 : index
    %91 = vector.load %arg6[%c0_21, %c0_22] : memref<2x10xf32, #tpu.memory_space<vmem>>, vector<2x10xf32>
    tpu.vector_store %arg6[%c0_21, %c0_22], %90 {strides = array<i32>} : memref<2x10xf32, #tpu.memory_space<vmem>>, vector<2x10xf32>,
    return
  }
}

</mosaic_0001>

<bundles_post_ra>
// kernel: tpu_custom_call.1
= control target key start
LH: loop header
LB: loop body
LE: loop exit
PB: predicated region body
PF: predicated region fallthrough
CT: control target
= control target key end

     0   :  { %11 = vsyncpa [#allocation3], 0  ;;  %s666_s0 = inlined_call_operand.vmem [shape: f32[16,24], index: 0, kind: input, shape index: {}]   ;;  %s667_s1 = inlined_call_operand.hbm [shape: f32[24,64], index: 1, kind: input, shape index: {}]   ;;  %s668_s2 = inlined_call_operand.vmem [shape: f32[64,64], index: 2, kind: input, shape index: {}]   ;;  %s669_s3 = inlined_call_operand.vmem [shape: f32[1,64], index: 3, kind: input, shape index: {}]   ;;  %s670_s4 = inlined_call_operand.vmem [shape: f32[64,10], index: 4, kind: input, shape index: {}]   ;;  %s671_s5 = inlined_call_operand.vmem [shape: f32[1,10], index: 5, kind: input, shape index: {}]   ;;  %s672_s6 = inlined_call_operand.hbm [shape: f32[2,10], index: 6, kind: output, shape index: {}]  }
   0x1   :  { %12 = vsyncpa [#allocation4], 0  ;;  %s19_s23 = sshll.u32 %s667_s1, 4  ;;  %s489_s24 = smov [#allocation2]   ;;  %s20_s23 = int_to_ptr.hbm [resolvable:$true] %s19_s23 }
   0x2   :  { %s21_s25 = sshll.u32 %s489_s24, 4  ;;  %s490_s26 = smov 128   ;;  %s22_s25 = int_to_ptr.vmem [resolvable:$true] %s21_s25 }
   0x3   :  { %s491_s27 = smov 8  }
   0x4   :  { %27 = dma.hbm_to_vmem [thread:$0]  %s20_s23, 384, %s22_s25, [#allocation3], %s490_s26, %s490_s26, %s491_s27  }
   0x5   :  { %485 = dma.done.wait [#allocation3], 384  }
   0x6   :  { %486 = vsyncadd [#allocation3], 4294966912  ;;  %v53_v0 = vld [vmem:[#allocation2 + $0x10] sm:$0xff]  ;;  %v535_v1 = vld [vmem:[%s668_s2 + $0x38] sm:$0xff]  ;;  %vm54_vm0 = vcmask 195584   ;;  %v492_v13 = vmov 0.0  }
   0x7   :  { %v52_v2 = vld [vmem:[#allocation2 + $0x8] sm:$0xff]  ;;  %74 = vmatpush.msra.mxu0 %v53_v0  ;;  %101 = vmatpush.msra.mxu1 %v535_v1  ;;  %v541_v3 = vld [vmem:[%s668_s2 + $0x30] sm:$0xff]  ;;  %v51_v4 = vld [vmem:[#allocation2] sm:$0xff]  ;;  %vm87_vm1 = vcmask 1040384   ;;  %vm89_vm2 = vcmask 523264   ;;  %s493_s15 = smov [#allocation5]  }
   0x8   :  { %v546_v5 = vld [vmem:[%s668_s2 + $0x28] sm:$0xff]  ;;  %135 = vmatpush.msra.mxu2 %v535_v1  ;;  %168 = vmatpush.msra.mxu3 %v535_v1  ;;  %v49_v6 = vld [vmem:[%s666_s0] sm:$0xff]  ;;  %v43_v8 = vld [vmem:[%s668_s2 + $0x18] sm:$0xff]  ;;  %s392_s16 = sshll.u32 %s493_s15, 4  ;;  %s394_s18 = sshll.u32 %s672_s6, 4  ;;  %vm385_vm3 = vcmask 74752   ;;  %s393_s16 = int_to_ptr.vmem [resolvable:$true] %s392_s16  ;;  %s395_s18 = int_to_ptr.hbm [resolvable:$true] %s394_s18 }
   0x9   :  { %75 = vmatpush.msra.mxu0 %v52_v2  ;;  %102 = vmatpush.msra.mxu1 %v541_v3  ;;  %v557_v7 = vld [vmem:[%s668_s2 + $0x20] sm:$0xff]  ;;  %v42_v9 = vld [vmem:[%s668_s2 + $0x10] sm:$0xff]  ;;  %v41_v10 = vld [vmem:[%s668_s2 + $0x8] sm:$0xff] }
   0xa   :  { %136 = vmatpush.msra.mxu2 %v541_v3  ;;  %169 = vmatpush.msra.mxu3 %v541_v3  ;;  %v50_v11 = vld [vmem:[%s666_s0 + $0x8] sm:$0xff]  ;;  %v40_v12 = vld [vmem:[%s668_s2] sm:$0xff] }
   0xb   :  { %76 = vmatpush.msra.mxu0 %v51_v4  ;;  %103 = vmatpush.msra.mxu1 %v546_v5  ;;  %v617_v40 = vld [vmem:[%s669_s3] ss:$0 sm:$0xff] }
   0xc   :  { %404 = vmatmul.msk.f32.vlgmr.msra.gmra.mxu0 %vm54_vm0, %v49_v6  ;;  %137 = vmatpush.msra.mxu2 %v546_v5 }
   0xd   :  { %104 = vmatpush.msra.mxu1 %v557_v7  ;;  %170 = vmatpush.msra.mxu3 %v546_v5 }
   0xe   :  { %138 = vmatpush.msra.mxu2 %v557_v7  ;;  %201 = vmatpush.msrb.mxu0 %v535_v1 }
   0xf   :  { %105 = vmatpush.msra.mxu1 %v43_v8  ;;  %171 = vmatpush.msra.mxu3 %v557_v7 }
  0x10   :  { %139 = vmatpush.msra.mxu2 %v43_v8  ;;  %202 = vmatpush.msrb.mxu0 %v541_v3 }
  0x11   :  { %106 = vmatpush.msra.mxu1 %v42_v9  ;;  %172 = vmatpush.msra.mxu3 %v43_v8 }
  0x12   :  { %140 = vmatpush.msra.mxu2 %v42_v9  ;;  %203 = vmatpush.msrb.mxu0 %v546_v5 }
  0x13   :  { %107 = vmatpush.msra.mxu1 %v41_v10  ;;  %173 = vmatpush.msra.mxu3 %v42_v9 }
  0x14   :  { %405 = vmatmul.msk.f32.gmra.mxu0 %vm54_vm0, %v50_v11  ;;  %141 = vmatpush.msra.mxu2 %v41_v10 }
  0x15   :  { %108 = vmatpush.msra.mxu1 %v40_v12  ;;  %174 = vmatpush.msra.mxu3 %v41_v10 }
  0x16   :  { %109 = vmatmul.f32.vlgmr.msra.gmra.mxu1 %v492_v13  ;;  %142 = vmatpush.msra.mxu2 %v40_v12 }
  0x17   :  { %175 = vmatpush.msra.mxu3 %v40_v12  ;;  %204 = vmatpush.msrb.mxu0 %v557_v7 }
  0x18   :  { %234 = vmatpush.msrb.mxu1 %v535_v1  ;;  %267 = vmatpush.msrb.mxu2 %v535_v1 }
  0x19   :  { %205 = vmatpush.msrb.mxu0 %v43_v8  ;;  %300 = vmatpush.msrb.mxu3 %v535_v1 }
  0x1a   :  { %235 = vmatpush.msrb.mxu1 %v541_v3  ;;  %268 = vmatpush.msrb.mxu2 %v541_v3 }
  0x1b   :  { %206 = vmatpush.msrb.mxu0 %v42_v9  ;;  %301 = vmatpush.msrb.mxu3 %v541_v3 }
  0x1c   :  { %236 = vmatpush.msrb.mxu1 %v546_v5  ;;  %269 = vmatpush.msrb.mxu2 %v546_v5 }
  0x1d   :  { %207 = vmatpush.msrb.mxu0 %v41_v10  ;;  %302 = vmatpush.msrb.mxu3 %v546_v5 }
  0x1e   :  { %237 = vmatpush.msrb.mxu1 %v557_v7  ;;  %270 = vmatpush.msrb.mxu2 %v557_v7 }
  0x1f   :  { %208 = vmatpush.msrb.mxu0 %v40_v12  ;;  %303 = vmatpush.msrb.mxu3 %v557_v7 }
  0x20   :  { %238 = vmatpush.msrb.mxu1 %v43_v8  ;;  %271 = vmatpush.msrb.mxu2 %v43_v8 }
  0x21   :  { %304 = vmatpush.msrb.mxu3 %v43_v8  ;;  %333 = vmatpush.msra.mxu0 %v535_v1 }
  0x22   :  { %239 = vmatpush.msrb.mxu1 %v42_v9  ;;  %272 = vmatpush.msrb.mxu2 %v42_v9 }
  0x23   :  { %305 = vmatpush.msrb.mxu3 %v42_v9  ;;  %334 = vmatpush.msra.mxu0 %v541_v3 }
  0x24   :  { %240 = vmatpush.msrb.mxu1 %v41_v10  ;;  %273 = vmatpush.msrb.mxu2 %v41_v10 }
  0x25   :  { %306 = vmatpush.msrb.mxu3 %v41_v10  ;;  %335 = vmatpush.msra.mxu0 %v546_v5 }
  0x26   :  { %241 = vmatpush.msrb.mxu1 %v40_v12  ;;  %274 = vmatpush.msrb.mxu2 %v40_v12 }
  0x27   :  { %307 = vmatpush.msrb.mxu3 %v40_v12  ;;  %336 = vmatpush.msra.mxu0 %v557_v7 }
  0x29   :  { %337 = vmatpush.msra.mxu0 %v43_v8 }
  0x2b   :  { %338 = vmatpush.msra.mxu0 %v42_v9 }
  0x2d   :  { %339 = vmatpush.msra.mxu0 %v41_v10 }
  0x2f   :  { %340 = vmatpush.msra.mxu0 %v40_v12 }
  0x89   :  { %v78_v14 = vpop.f32.mrf.mxu0 }
  0x8a   :  { %v121_v15 = vrot.slane %v78_v14, 1  ;;  %v152_v16 = vrot.slane %v78_v14, 2  ;;  %v185_v18 = vrot.slane %v78_v14, 3  ;;  %v218_v19 = vrot.slane %v78_v14, 4 }
  0x8b   :  { %v251_v20 = vrot.slane %v78_v14, 5  ;;  %v284_v21 = vrot.slane %v78_v14, 6  ;;  %v317_v34 = vrot.slane %v78_v14, 7 }
  0x91   :  { %v81_v17 = vpop.f32.mrf.mxu0 }
  0x92   :  { %v85_v22 = vrot.slane %v81_v17, 7  ;;  %v123_v23 = vsel %vm87_vm1, %v121_v15, %v81_v17  ;;  %v154_v24 = vrot.slane %v81_v17, 1  ;;  %v187_v25 = vrot.slane %v81_v17, 2  ;;  %v357_v15 = vld [vmem:[%s670_s4 + $0x38] sm:$0xff] }
  0x93   :  { %v110_v26 = vpop.f32.mrf.mxu1  ;;  %v220_v27 = vrot.slane %v81_v17, 3  ;;  %v253_v28 = vrot.slane %v81_v17, 4  ;;  %v286_v29 = vrot.slane %v81_v17, 5  ;;  %v319_v30 = vrot.slane %v81_v17, 6  ;;  %373 = vmatpush.msra.mxu1 %v357_v15  ;;  %v355_v17 = vld [vmem:[%s670_s4 + $0x28] sm:$0xff] }
  0x94   :  { %v88_v31 = vsel %vm87_vm1, %v78_v14, %v85_v22  ;;  %v156_v32 = vsel %vm87_vm1, %v152_v16, %v154_v24  ;;  %v189_v33 = vsel %vm87_vm1, %v185_v18, %v187_v25  ;;  %v356_v16 = vld [vmem:[%s670_s4 + $0x30] sm:$0xff]  ;;  %v354_v18 = vld [vmem:[%s670_s4 + $0x20] sm:$0xff] }
  0x95   :  { %v113_v35 = vadd.f32 %v110_v26, %v88_v31  ;;  %v222_v36 = vsel %vm87_vm1, %v218_v19, %v220_v27  ;;  %v255_v37 = vsel %vm87_vm1, %v251_v20, %v253_v28  ;;  %v288_v38 = vsel %vm87_vm1, %v284_v21, %v286_v29  ;;  %374 = vmatpush.msra.mxu1 %v356_v16  ;;  %v353_v19 = vld [vmem:[%s670_s4 + $0x18] sm:$0xff]  ;;  %v352_v20 = vld [vmem:[%s670_s4 + $0x10] sm:$0xff]  ;;  %v351_v21 = vld [vmem:[%s670_s4 + $0x8] sm:$0xff] }
  0x96   :  { %v612_v39 = vsel %vm87_vm1, %v317_v34, %v319_v30  ;;  %v350_v22 = vld [vmem:[%s670_s4] sm:$0xff] }
  0x97   :  { %421 = vtanh.f32 %v113_v35  ;;  %375 = vmatpush.msra.mxu1 %v355_v17  ;;  %v420_v29 = vld [vmem:[%s671_s5] ss:$0 sm:$0xff] }
  0x99   :  { %376 = vmatpush.msra.mxu1 %v354_v18 }
  0x9b   :  { %377 = vmatpush.msra.mxu1 %v353_v19 }
  0x9d   :  { %v422_v41 = vpop.eup %421  ;;  %378 = vmatpush.msra.mxu1 %v352_v20 }
  0x9e   :  { %v118_v42 = vmul.f32 %v422_v41, %v617_v40 }
  0x9f   :  { %379 = vmatpush.msra.mxu1 %v351_v21 }
  0xa0   :  { %406 = vmatmul.msk.f32.vlgmr.msra.gmra.mxu2 %vm89_vm2, %v118_v42 }
  0xa1   :  { %380 = vmatpush.msra.mxu1 %v350_v22 }
 0x123   :  { %v144_v43 = vpop.f32.mrf.mxu2 }
 0x124   :  { %v147_v44 = vadd.f32 %v144_v43, %v123_v23 }
 0x126   :  { %423 = vtanh.f32 %v147_v44 }
 0x12c   :  { %v424_v45 = vpop.eup %423 }
 0x12d   :  { %v149_v46 = vsub.f32 %v424_v45, %v118_v42 }
 0x12f   :  { %v150_v47 = vmul.f32 %v617_v40, %v149_v46 }
 0x131   :  { %v151_v48 = vadd.f32 %v150_v47, %v118_v42 }
 0x133   :  { %407 = vmatmul.msk.f32.vlgmr.msra.gmra.mxu3 %vm89_vm2, %v151_v48 }
 0x1b6   :  { %v177_v49 = vpop.f32.mrf.mxu3 }
 0x1b7   :  { %v180_v50 = vadd.f32 %v177_v49, %v156_v32 }
 0x1b9   :  { %425 = vtanh.f32 %v180_v50 }
 0x1bf   :  { %v426_v51 = vpop.eup %425 }
 0x1c0   :  { %v182_v52 = vsub.f32 %v426_v51, %v151_v48 }
 0x1c2   :  { %v183_v53 = vmul.f32 %v617_v40, %v182_v52 }
 0x1c4   :  { %v184_v54 = vadd.f32 %v183_v53, %v151_v48 }
 0x1c6   :  { %408 = vmatmul.msk.f32.vlgmr.msrb.gmra.mxu0 %vm89_vm2, %v184_v54 }
 0x243   :  { %v210_v55 = vpop.f32.mrf.mxu0 }
 0x244   :  { %v213_v56 = vadd.f32 %v210_v55, %v189_v33 }
 0x246   :  { %427 = vtanh.f32 %v213_v56 }
 0x24c   :  { %v428_v57 = vpop.eup %427 }
 0x24d   :  { %v215_v58 = vsub.f32 %v428_v57, %v184_v54 }
 0x24f   :  { %v216_v59 = vmul.f32 %v617_v40, %v215_v58 }
 0x251   :  { %v217_v60 = vadd.f32 %v216_v59, %v184_v54 }
 0x253   :  { %409 = vmatmul.msk.f32.vlgmr.msrb.gmra.mxu1 %vm89_vm2, %v217_v60 }
 0x2d0   :  { %v243_v61 = vpop.f32.mrf.mxu1 }
 0x2d1   :  { %v246_v62 = vadd.f32 %v243_v61, %v222_v36 }
 0x2d3   :  { %429 = vtanh.f32 %v246_v62 }
 0x2d9   :  { %v430_v63 = vpop.eup %429 }
 0x2da   :  { %v248_v0 = vsub.f32 %v430_v63, %v217_v60 }
 0x2dc   :  { %v249_v1 = vmul.f32 %v617_v40, %v248_v0 }
 0x2de   :  { %v250_v2 = vadd.f32 %v249_v1, %v217_v60 }
 0x2e0   :  { %410 = vmatmul.msk.f32.vlgmr.msrb.gmra.mxu2 %vm89_vm2, %v250_v2 }
 0x363   :  { %v276_v3 = vpop.f32.mrf.mxu2 }
 0x364   :  { %v279_v4 = vadd.f32 %v276_v3, %v255_v37 }
 0x366   :  { %431 = vtanh.f32 %v279_v4 }
 0x36c   :  { %v432_v5 = vpop.eup %431 }
 0x36d   :  { %v281_v6 = vsub.f32 %v432_v5, %v250_v2 }
 0x36f   :  { %v282_v7 = vmul.f32 %v617_v40, %v281_v6 }
 0x371   :  { %v283_v8 = vadd.f32 %v282_v7, %v250_v2 }
 0x373   :  { %411 = vmatmul.msk.f32.vlgmr.msrb.gmra.mxu3 %vm89_vm2, %v283_v8 }
 0x3f6   :  { %v309_v9 = vpop.f32.mrf.mxu3 }
 0x3f7   :  { %v312_v10 = vadd.f32 %v309_v9, %v288_v38 }
 0x3f9   :  { %433 = vtanh.f32 %v312_v10 }
 0x3ff   :  { %v434_v11 = vpop.eup %433 }
 0x400   :  { %v314_v12 = vsub.f32 %v434_v11, %v283_v8 }
 0x402   :  { %v315_v13 = vmul.f32 %v617_v40, %v314_v12 }
 0x404   :  { %v316_v14 = vadd.f32 %v315_v13, %v283_v8 }
 0x406   :  { %412 = vmatmul.msk.f32.vlgmr.msra.gmra.mxu0 %vm89_vm2, %v316_v14 }
 0x483   :  { %v342_v23 = vpop.f32.mrf.mxu0 }
 0x484   :  { %v345_v24 = vadd.f32 %v342_v23, %v612_v39 }
 0x486   :  { %435 = vtanh.f32 %v345_v24 }
 0x48c   :  { %v436_v25 = vpop.eup %435 }
 0x48d   :  { %v347_v26 = vsub.f32 %v436_v25, %v316_v14 }
 0x48f   :  { %v348_v27 = vmul.f32 %v617_v40, %v347_v26 }
 0x491   :  { %v349_v28 = vadd.f32 %v348_v27, %v316_v14 }
 0x493   :  { %413 = vmatmul.msk.f32.vlgmr.msra.gmra.mxu1 %vm89_vm2, %v349_v28 }
 0x510   :  { %v382_v30 = vpop.f32.mrf.mxu1 }
 0x511   :  { %v383_v31 = vadd.f32 %v420_v29, %v382_v30 }
 0x513   :  { %386 = vst.msk [vmem:[#allocation5] sm:$0x3] %vm385_vm3, %v383_v31 }
 0x514   :  { %397 = dma.vmem_to_hbm [thread:$0]  %s393_s16, 32, %s395_s18, [#allocation4]  }
 0x515   :  { %487 = dma.done.wait [#allocation4], 32  }
 0x516   :  { %488 = vsyncadd [#allocation4], 4294967264 }
 0x517   :  { %402 = vsyncpa [#allocation3], 1 }
 0x518   :  { %403 = vsyncpa [#allocation4], 1 }

</bundles_post_ra>
